<compile_context>
chip_gen: v7x
topology: tpu7x:2x2x1
jax: 0.10.0
libtpu: 0.0.40
codegen_flags: <defaults>
</compile_context>

<pallas_src>
import functools

import jax
import jax.numpy as jnp
from jax import lax
from jax.experimental import pallas as pl
from jax.experimental.pallas import tpu as pltpu


def _round_up(a, b):
    return ((a + b - 1) // b) * b


def _mha_kernel(x_ref, w_ref, o_ref,
                k_ref, v_ref, q_ref, m_ref, l_ref, acc_ref,
                *, num_heads, head_dim, block_q):
    """One (batch, q-tile) grid step of fused multi-head causal attention.

    x_ref  : (1, T_pad, D_in)   bf16  full (padded) sequence of this batch elem
    w_ref  : (D_in, 3*H*D)      bf16  fused [Q | K | V] weights (head-major)
    o_ref  : (1, block_q, H*D)  final concatenated-head layout
    k_ref  : (H, T_pad, D)      bf16 scratch, K projection (persists over qi)
    v_ref  : (H, T_pad, D)      bf16 scratch, V projection (persists over qi)
    q_ref  : (H, block_q, D)    bf16 scratch, per-head Q of this tile
    m_ref  : (H, block_q, 1)    f32  online-softmax running max
    l_ref  : (H, block_q, 1)    f32  online-softmax running denominator
    acc_ref: (H, block_q, D)    f32  online-softmax running numerator
    """
    H, D = num_heads, head_dim
    hd = H * D
    qi = pl.program_id(1)

    # ---- K/V projection: once per batch element, reused by all Q tiles. ----
    @pl.when(qi == 0)
    def _():
        kv = jnp.dot(x_ref[0], w_ref[:, hd:],
                     preferred_element_type=jnp.float32)        # (T_pad, 2*hd)
        kv = kv.astype(jnp.bfloat16)        # single cast; bf16-resident K/V
        for h in range(H):                  # static unroll -> head-major scratch
            k_ref[h] = kv[:, h * D:(h + 1) * D]
            v_ref[h] = kv[:, hd + h * D: hd + (h + 1) * D]

    # ---- Q projection for this tile only; fold 1/sqrt(D) into Q. ----
    q_start = pl.multiple_of(qi * block_q, block_q)
    x_q = x_ref[0, pl.ds(q_start, block_q), :]                   # (bq, D_in)
    q = jnp.dot(x_q, w_ref[:, :hd], preferred_element_type=jnp.float32)
    q = (q * (1.0 / float(D) ** 0.5)).astype(jnp.bfloat16)       # (bq, hd)
    for h in range(H):
        q_ref[h] = q[:, h * D:(h + 1) * D]
    q_heads = q_ref[...]                                         # (H, bq, D)

    # ---- Online softmax over causal KV tiles: only blocks j <= qi. ----
    m_ref[...] = jnp.full((H, block_q, 1), -1e30, jnp.float32)
    l_ref[...] = jnp.zeros((H, block_q, 1), jnp.float32)
    acc_ref[...] = jnp.zeros((H, block_q, D), jnp.float32)

    row = q_start + lax.broadcasted_iota(jnp.int32, (block_q, block_q), 0)

    @pl.loop(0, qi + 1)
    def _(j):
        kv_start = pl.multiple_of(j * block_q, block_q)
        k_blk = k_ref[:, pl.ds(kv_start, block_q), :]            # (H, bk, D)
        v_blk = v_ref[:, pl.ds(kv_start, block_q), :]            # (H, bk, D)

        # Batched over heads -> back-to-back MXU pushes, f32 accumulation.
        s = jnp.einsum('hqd,hkd->hqk', q_heads, k_blk,
                       preferred_element_type=jnp.float32)       # (H, bq, bk)
        col = kv_start + lax.broadcasted_iota(jnp.int32, (block_q, block_q), 1)
        s = jnp.where((col > row)[None], jnp.float32(-1e30), s)

        m_prev = m_ref[...]
        m_new = jnp.maximum(m_prev, jnp.max(s, axis=-1, keepdims=True))
        alpha = jnp.exp(m_prev - m_new)
        p = jnp.exp(s - m_new)                                   # f32 exp (v5e-safe)
        l_ref[...] = alpha * l_ref[...] + jnp.sum(p, axis=-1, keepdims=True)
        pv = jnp.einsum('hqk,hkd->hqd', p.astype(jnp.bfloat16), v_blk,
                        preferred_element_type=jnp.float32)      # (H, bq, D)
        acc_ref[...] = alpha * acc_ref[...] + pv
        m_ref[...] = m_new

    # ---- Normalize AFTER PV: block_q*D elements per head, not block_q*T. ----
    out = acc_ref[...] * pl.reciprocal(l_ref[...], approx=True)  # (H, bq, D)
    for h in range(H):                       # direct per-head stores, no concat
        o_ref[0, :, h * D:(h + 1) * D] = out[h].astype(o_ref.dtype)


def multi_head_attention_sequential(x, wq, wk, wv, *, block_q=256):
    """
    x          : (B, T, D_in)
    wq, wk, wv : (H, D_in, D_out)  per-head projection weights (x @ W layout,
                                    i.e. transposed from PyTorch nn.Linear)
    returns    : (B, T, H * D_out) == torch.cat([head(x) for head in heads], -1)
    """
    B, T, D_in = x.shape
    H, _, D_out = wq.shape
    hd = H * D_out
    out_dtype = x.dtype

    # Fuse all heads + Q/K/V into one bf16 weight (D_in, 3*hd); columns are
    # [Q(h0..h_{H-1}) | K(h0..) | V(h0..)], head-major inside each block.
    def stack(w):                            # (H, D_in, D_out) -> (D_in, H*D_out)
        return jnp.transpose(w, (1, 0, 2)).reshape(D_in, hd)

    w_qkv = jnp.concatenate([stack(wq), stack(wk), stack(wv)],
                            axis=-1).astype(jnp.bfloat16)

    # Q/KV tile: 256 targets the 256-wide MXUs (v6e/v7x); clipped for short
    # sequences. T is padded to a multiple of block_q (no (T, T) fallback).
    block_q = max(8, min(block_q, _round_up(T, 8)))
    t_pad = _round_up(T, block_q)
    num_q = t_pad // block_q

    x_p = x.astype(jnp.bfloat16)
    if t_pad != T:
        x_p = jnp.pad(x_p, ((0, 0), (0, t_pad - T), (0, 0)))

    kernel = functools.partial(_mha_kernel, num_heads=H, head_dim=D_out,
                               block_q=block_q)

    # Scoped-VMEM budget sized to the real working set (defaults: 16/32 MiB).
    est = (2 * t_pad * D_in * 2              # x block (double-buffered), bf16
           + 2 * D_in * 3 * hd * 2           # fused weights (double-buffered)
           + 2 * block_q * hd * 4            # output block (double-buffered)
           + 2 * H * t_pad * D_out * 2       # K + V scratch (bf16)
           + t_pad * 2 * hd * 4              # transient f32 KV projection
           + H * block_q * D_out * 2         # Q scratch (bf16)
           + H * block_q * (D_out + 2) * 4   # m / l / acc scratch (f32)
           + 4 * H * block_q * block_q * 4)  # score/prob transients (f32)
    vmem_limit = int(min(max(2 * est, 32 * 1024 * 1024), 64 * 1024 * 1024))

    out = pl.pallas_call(
        kernel,
        out_shape=jax.ShapeDtypeStruct((B, t_pad, hd), out_dtype),
        grid_spec=pltpu.PrefetchScalarGridSpec(
            num_scalar_prefetch=0,
            grid=(B, num_q),
            in_specs=[
                # Full (padded) sequence; block index constant across qi, so it
                # is DMA'd once per batch element.
                pl.BlockSpec((1, t_pad, D_in), lambda b, qi: (b, 0, 0)),
                # Tiny fused weights; constant block for the whole grid.
                pl.BlockSpec((D_in, 3 * hd), lambda b, qi: (0, 0)),
            ],
            out_specs=pl.BlockSpec((1, block_q, hd), lambda b, qi: (b, qi, 0)),
            scratch_shapes=[
                pltpu.VMEM((H, t_pad, D_out), jnp.bfloat16),    # K cache
                pltpu.VMEM((H, t_pad, D_out), jnp.bfloat16),    # V cache
                pltpu.VMEM((H, block_q, D_out), jnp.bfloat16),  # Q (this tile)
                pltpu.VMEM((H, block_q, 1), jnp.float32),       # running max
                pltpu.VMEM((H, block_q, 1), jnp.float32),       # running denom
                pltpu.VMEM((H, block_q, D_out), jnp.float32),   # running numer
            ],
        ),
        compiler_params=pltpu.CompilerParams(
            # Batch stays megacore-parallel; qi must be "arbitrary" because the
            # K/V scratch persists across the Q tiles of one batch element.
            dimension_semantics=("parallel", "arbitrary"),
            vmem_limit_bytes=vmem_limit,
        ),
    )(x_p, w_qkv)

    if t_pad != T:
        out = out[:, :T, :]
    return out


def _reference(x, wq, wk, wv):
    """Pure-JAX f32 reference reproducing CausalAttention semantics (eval)."""
    B, T, D_in = x.shape
    H, _, D_out = wq.shape
    outs = []
    for h in range(H):
        q = x @ wq[h]
        k = x @ wk[h]
        v = x @ wv[h]
        scores = jnp.einsum("btd,bsd->bts", q, k)
        mask = jnp.triu(jnp.ones((T, T), dtype=bool), k=1)
        scores = jnp.where(mask[None], -jnp.inf, scores)
        attn = jax.nn.softmax(scores / jnp.sqrt(jnp.float32(D_out)), axis=-1)
        outs.append(jnp.einsum("bts,bsd->btd", attn, v))
    return jnp.concatenate(outs, axis=-1)


if __name__ == "__main__":
    # batch=2, seq (context_len)=8, input_dim=16, output_dim=8, num_heads=4
    B, T, D_in, D_out, H = 2, 8, 16, 8, 4

    key = jax.random.PRNGKey(0)
    kx, kq, kk, kv = jax.random.split(key, 4)
    x = jax.random.normal(kx, (B, T, D_in), dtype=jnp.float32)
    # Deterministic per-head projection weights (qkv_bias=False).
    wq = jax.random.normal(kq, (H, D_in, D_out), dtype=jnp.float32) * 0.1
    wk = jax.random.normal(kk, (H, D_in, D_out), dtype=jnp.float32) * 0.1
    wv = jax.random.normal(kv, (H, D_in, D_out), dtype=jnp.float32) * 0.1

    out = multi_head_attention_sequential(x, wq, wk, wv)
    out = jax.block_until_ready(out)

    ref = _reference(x, wq, wk, wv)
    assert out.shape == (B, T, H * D_out), out.shape
    # bf16 MXU inputs with f32 accumulation -> relaxed tolerance vs f32 ref.
    max_diff = float(jnp.max(jnp.abs(out - ref)))
    assert jnp.allclose(out, ref, atol=3e-2, rtol=3e-2), (
        f"mismatch vs reference; max abs diff = {max_diff:e}")

    print("KERNEL_OK")
</pallas_src>

<mosaic_0001>
module attributes {stable_mosaic.version = 11 : i64} {
  func.func @_mha_kernel(%arg0: i32, %arg1: i32, %arg2: memref<1x8x16xbf16, #tpu.memory_space<vmem>>, %arg3: memref<16x96xbf16, #tpu.memory_space<vmem>>, %arg4: memref<1x8x32xf32, #tpu.memory_space<vmem>>, %arg5: memref<4x8x8xbf16, #tpu.memory_space<vmem>>, %arg6: memref<4x8x8xbf16, #tpu.memory_space<vmem>>, %arg7: memref<4x8x8xbf16, #tpu.memory_space<vmem>>, %arg8: memref<4x8x1xf32, #tpu.memory_space<vmem>>, %arg9: memref<4x8x1xf32, #tpu.memory_space<vmem>>, %arg10: memref<4x8x8xf32, #tpu.memory_space<vmem>>) attributes {dimension_semantics = [#tpu.dimension_semantics<parallel>, #tpu.dimension_semantics<arbitrary>], iteration_bounds = array<i64: 2, 1>, scalar_prefetch = 0 : i64, scratch_operands = 6 : i64, tpu.core_type = #tpu.core_type<tc>, window_params = [{transform_indices = @transform_0, window_bounds = array<i64: 1, 8, 16>}, {pipeline_mode = #tpu.pipeline_mode<synchronous>, transform_indices = @transform_1, window_bounds = array<i64: 16, 96>}, {transform_indices = @transform_2, window_bounds = array<i64: 1, 8, 32>}]} {
    %c0_i32 = arith.constant 0 : i32
    %0 = arith.cmpi eq, %arg1, %c0_i32 : i32
    %1 = arith.extui %0 : i1 to i32
    %c0_i32_0 = arith.constant 0 : i32
    %2 = arith.cmpi ne, %1, %c0_i32_0 : i32
    scf.if %2 {
      %c0_52 = arith.constant 0 : index
      %c0_53 = arith.constant 0 : index
      %c0_54 = arith.constant 0 : index
      %71 = vector.load %arg2[%c0_52, %c0_53, %c0_54] : memref<1x8x16xbf16, #tpu.memory_space<vmem>>, vector<1x8x16xbf16>
      %72 = vector.shape_cast %71 : vector<1x8x16xbf16> to vector<8x16xbf16>
      %c0_55 = arith.constant 0 : index
      %c32 = arith.constant 32 : index
      %73 = vector.load %arg3[%c0_55, %c32] : memref<16x96xbf16, #tpu.memory_space<vmem>>, vector<16x64xbf16>
      %cst_56 = arith.constant dense<0.000000e+00> : vector<8x64xf32>
      %74 = tpu.matmul %72, %73, %cst_56 {dimension_numbers = #tpu.dot_dimension_numbers<[1], [0], [0], [1], [0, 0, 1, 1], [], []>} : vector<8x16xbf16>, vector<16x64xbf16>, vector<8x64xf32> -> vector<8x64xf32>
      %75 = arith.truncf %74 : vector<8x64xf32> to vector<8x64xbf16>
      %76 = vector.extract_strided_slice %75 {offsets = [0, 0], sizes = [8, 8], strides = [1, 1]} : vector<8x64xbf16> to vector<8x8xbf16>
      %c0_57 = arith.constant 0 : index
      %c0_58 = arith.constant 0 : index
      %c0_59 = arith.constant 0 : index
      %77 = vector.load %arg5[%c0_57, %c0_58, %c0_59] : memref<4x8x8xbf16, #tpu.memory_space<vmem>>, vector<1x8x8xbf16>
      %78 = vector.shape_cast %77 : vector<1x8x8xbf16> to vector<8x8xbf16>
      %79 = vector.shape_cast %76 : vector<8x8xbf16> to vector<1x8x8xbf16>
      tpu.vector_store %arg5[%c0_57, %c0_58, %c0_59], %79 {strides = array<i32>} : memref<4x8x8xbf16, #tpu.memory_space<vmem>>, vector<1x8x8xbf16>,
      %80 = vector.extract_strided_slice %75 {offsets = [0, 32], sizes = [8, 8], strides = [1, 1]} : vector<8x64xbf16> to vector<8x8xbf16>
      %c0_60 = arith.constant 0 : index
      %c0_61 = arith.constant 0 : index
      %c0_62 = arith.constant 0 : index
      %81 = vector.load %arg6[%c0_60, %c0_61, %c0_62] : memref<4x8x8xbf16, #tpu.memory_space<vmem>>, vector<1x8x8xbf16>
      %82 = vector.shape_cast %81 : vector<1x8x8xbf16> to vector<8x8xbf16>
      %83 = vector.shape_cast %80 : vector<8x8xbf16> to vector<1x8x8xbf16>
      tpu.vector_store %arg6[%c0_60, %c0_61, %c0_62], %83 {strides = array<i32>} : memref<4x8x8xbf16, #tpu.memory_space<vmem>>, vector<1x8x8xbf16>,
      %84 = vector.extract_strided_slice %75 {offsets = [0, 8], sizes = [8, 8], strides = [1, 1]} : vector<8x64xbf16> to vector<8x8xbf16>
      %c1_63 = arith.constant 1 : index
      %c0_64 = arith.constant 0 : index
      %c0_65 = arith.constant 0 : index
      %85 = vector.load %arg5[%c1_63, %c0_64, %c0_65] : memref<4x8x8xbf16, #tpu.memory_space<vmem>>, vector<1x8x8xbf16>
      %86 = vector.shape_cast %85 : vector<1x8x8xbf16> to vector<8x8xbf16>
      %87 = vector.shape_cast %84 : vector<8x8xbf16> to vector<1x8x8xbf16>
      tpu.vector_store %arg5[%c1_63, %c0_64, %c0_65], %87 {strides = array<i32>} : memref<4x8x8xbf16, #tpu.memory_space<vmem>>, vector<1x8x8xbf16>,
      %88 = vector.extract_strided_slice %75 {offsets = [0, 40], sizes = [8, 8], strides = [1, 1]} : vector<8x64xbf16> to vector<8x8xbf16>
      %c1_66 = arith.constant 1 : index
      %c0_67 = arith.constant 0 : index
      %c0_68 = arith.constant 0 : index
      %89 = vector.load %arg6[%c1_66, %c0_67, %c0_68] : memref<4x8x8xbf16, #tpu.memory_space<vmem>>, vector<1x8x8xbf16>
      %90 = vector.shape_cast %89 : vector<1x8x8xbf16> to vector<8x8xbf16>
      %91 = vector.shape_cast %88 : vector<8x8xbf16> to vector<1x8x8xbf16>
      tpu.vector_store %arg6[%c1_66, %c0_67, %c0_68], %91 {strides = array<i32>} : memref<4x8x8xbf16, #tpu.memory_space<vmem>>, vector<1x8x8xbf16>,
      %92 = vector.extract_strided_slice %75 {offsets = [0, 16], sizes = [8, 8], strides = [1, 1]} : vector<8x64xbf16> to vector<8x8xbf16>
      %c2_69 = arith.constant 2 : index
      %c0_70 = arith.constant 0 : index
      %c0_71 = arith.constant 0 : index
      %93 = vector.load %arg5[%c2_69, %c0_70, %c0_71] : memref<4x8x8xbf16, #tpu.memory_space<vmem>>, vector<1x8x8xbf16>
      %94 = vector.shape_cast %93 : vector<1x8x8xbf16> to vector<8x8xbf16>
      %95 = vector.shape_cast %92 : vector<8x8xbf16> to vector<1x8x8xbf16>
      tpu.vector_store %arg5[%c2_69, %c0_70, %c0_71], %95 {strides = array<i32>} : memref<4x8x8xbf16, #tpu.memory_space<vmem>>, vector<1x8x8xbf16>,
      %96 = vector.extract_strided_slice %75 {offsets = [0, 48], sizes = [8, 8], strides = [1, 1]} : vector<8x64xbf16> to vector<8x8xbf16>
      %c2_72 = arith.constant 2 : index
      %c0_73 = arith.constant 0 : index
      %c0_74 = arith.constant 0 : index
      %97 = vector.load %arg6[%c2_72, %c0_73, %c0_74] : memref<4x8x8xbf16, #tpu.memory_space<vmem>>, vector<1x8x8xbf16>
      %98 = vector.shape_cast %97 : vector<1x8x8xbf16> to vector<8x8xbf16>
      %99 = vector.shape_cast %96 : vector<8x8xbf16> to vector<1x8x8xbf16>
      tpu.vector_store %arg6[%c2_72, %c0_73, %c0_74], %99 {strides = array<i32>} : memref<4x8x8xbf16, #tpu.memory_space<vmem>>, vector<1x8x8xbf16>,
      %100 = vector.extract_strided_slice %75 {offsets = [0, 24], sizes = [8, 8], strides = [1, 1]} : vector<8x64xbf16> to vector<8x8xbf16>
      %c3_75 = arith.constant 3 : index
      %c0_76 = arith.constant 0 : index
      %c0_77 = arith.constant 0 : index
      %101 = vector.load %arg5[%c3_75, %c0_76, %c0_77] : memref<4x8x8xbf16, #tpu.memory_space<vmem>>, vector<1x8x8xbf16>
      %102 = vector.shape_cast %101 : vector<1x8x8xbf16> to vector<8x8xbf16>
      %103 = vector.shape_cast %100 : vector<8x8xbf16> to vector<1x8x8xbf16>
      tpu.vector_store %arg5[%c3_75, %c0_76, %c0_77], %103 {strides = array<i32>} : memref<4x8x8xbf16, #tpu.memory_space<vmem>>, vector<1x8x8xbf16>,
      %104 = vector.extract_strided_slice %75 {offsets = [0, 56], sizes = [8, 8], strides = [1, 1]} : vector<8x64xbf16> to vector<8x8xbf16>
      %c3_78 = arith.constant 3 : index
      %c0_79 = arith.constant 0 : index
      %c0_80 = arith.constant 0 : index
      %105 = vector.load %arg6[%c3_78, %c0_79, %c0_80] : memref<4x8x8xbf16, #tpu.memory_space<vmem>>, vector<1x8x8xbf16>
      %106 = vector.shape_cast %105 : vector<1x8x8xbf16> to vector<8x8xbf16>
      %107 = vector.shape_cast %104 : vector<8x8xbf16> to vector<1x8x8xbf16>
      tpu.vector_store %arg6[%c3_78, %c0_79, %c0_80], %107 {strides = array<i32>} : memref<4x8x8xbf16, #tpu.memory_space<vmem>>, vector<1x8x8xbf16>,
    } else {
    }
    %c8_i32 = arith.constant 8 : i32
    %3 = arith.muli %arg1, %c8_i32 : i32
    %4 = tpu.assume_multiple %3, 8 : i32
    %c0 = arith.constant 0 : index
    %5 = arith.index_cast %4 : i32 to index
    %c0_1 = arith.constant 0 : index
    %6 = vector.load %arg2[%c0, %5, %c0_1] : memref<1x8x16xbf16, #tpu.memory_space<vmem>>, vector<1x8x16xbf16>
    %7 = vector.shape_cast %6 : vector<1x8x16xbf16> to vector<8x16xbf16>
    %c0_2 = arith.constant 0 : index
    %c0_3 = arith.constant 0 : index
    %8 = vector.load %arg3[%c0_2, %c0_3] : memref<16x96xbf16, #tpu.memory_space<vmem>>, vector<16x32xbf16>
    %cst = arith.constant dense<0.000000e+00> : vector<8x32xf32>
    %9 = tpu.matmul %7, %8, %cst {dimension_numbers = #tpu.dot_dimension_numbers<[1], [0], [0], [1], [0, 0, 1, 1], [], []>} : vector<8x16xbf16>, vector<16x32xbf16>, vector<8x32xf32> -> vector<8x32xf32>
    %cst_4 = arith.constant 0.353553385 : f32
    %10 = vector.broadcast %cst_4 : f32 to vector<8x32xf32>
    %11 = arith.mulf %9, %10 : vector<8x32xf32>
    %12 = arith.truncf %11 : vector<8x32xf32> to vector<8x32xbf16>
    %13 = vector.extract_strided_slice %12 {offsets = [0, 0], sizes = [8, 8], strides = [1, 1]} : vector<8x32xbf16> to vector<8x8xbf16>
    %c0_5 = arith.constant 0 : index
    %c0_6 = arith.constant 0 : index
    %c0_7 = arith.constant 0 : index
    %14 = vector.load %arg7[%c0_5, %c0_6, %c0_7] : memref<4x8x8xbf16, #tpu.memory_space<vmem>>, vector<1x8x8xbf16>
    %15 = vector.shape_cast %14 : vector<1x8x8xbf16> to vector<8x8xbf16>
    %16 = vector.shape_cast %13 : vector<8x8xbf16> to vector<1x8x8xbf16>
    tpu.vector_store %arg7[%c0_5, %c0_6, %c0_7], %16 {strides = array<i32>} : memref<4x8x8xbf16, #tpu.memory_space<vmem>>, vector<1x8x8xbf16>,
    %17 = vector.extract_strided_slice %12 {offsets = [0, 8], sizes = [8, 8], strides = [1, 1]} : vector<8x32xbf16> to vector<8x8xbf16>
    %c1 = arith.constant 1 : index
    %c0_8 = arith.constant 0 : index
    %c0_9 = arith.constant 0 : index
    %18 = vector.load %arg7[%c1, %c0_8, %c0_9] : memref<4x8x8xbf16, #tpu.memory_space<vmem>>, vector<1x8x8xbf16>
    %19 = vector.shape_cast %18 : vector<1x8x8xbf16> to vector<8x8xbf16>
    %20 = vector.shape_cast %17 : vector<8x8xbf16> to vector<1x8x8xbf16>
    tpu.vector_store %arg7[%c1, %c0_8, %c0_9], %20 {strides = array<i32>} : memref<4x8x8xbf16, #tpu.memory_space<vmem>>, vector<1x8x8xbf16>,
    %21 = vector.extract_strided_slice %12 {offsets = [0, 16], sizes = [8, 8], strides = [1, 1]} : vector<8x32xbf16> to vector<8x8xbf16>
    %c2 = arith.constant 2 : index
    %c0_10 = arith.constant 0 : index
    %c0_11 = arith.constant 0 : index
    %22 = vector.load %arg7[%c2, %c0_10, %c0_11] : memref<4x8x8xbf16, #tpu.memory_space<vmem>>, vector<1x8x8xbf16>
    %23 = vector.shape_cast %22 : vector<1x8x8xbf16> to vector<8x8xbf16>
    %24 = vector.shape_cast %21 : vector<8x8xbf16> to vector<1x8x8xbf16>
    tpu.vector_store %arg7[%c2, %c0_10, %c0_11], %24 {strides = array<i32>} : memref<4x8x8xbf16, #tpu.memory_space<vmem>>, vector<1x8x8xbf16>,
    %25 = vector.extract_strided_slice %12 {offsets = [0, 24], sizes = [8, 8], strides = [1, 1]} : vector<8x32xbf16> to vector<8x8xbf16>
    %c3 = arith.constant 3 : index
    %c0_12 = arith.constant 0 : index
    %c0_13 = arith.constant 0 : index
    %26 = vector.load %arg7[%c3, %c0_12, %c0_13] : memref<4x8x8xbf16, #tpu.memory_space<vmem>>, vector<1x8x8xbf16>
    %27 = vector.shape_cast %26 : vector<1x8x8xbf16> to vector<8x8xbf16>
    %28 = vector.shape_cast %25 : vector<8x8xbf16> to vector<1x8x8xbf16>
    tpu.vector_store %arg7[%c3, %c0_12, %c0_13], %28 {strides = array<i32>} : memref<4x8x8xbf16, #tpu.memory_space<vmem>>, vector<1x8x8xbf16>,
    %c0_14 = arith.constant 0 : index
    %c0_15 = arith.constant 0 : index
    %c0_16 = arith.constant 0 : index
    %29 = vector.load %arg7[%c0_14, %c0_15, %c0_16] : memref<4x8x8xbf16, #tpu.memory_space<vmem>>, vector<4x8x8xbf16>
    %cst_17 = arith.constant -1.000000e+30 : f32
    %30 = vector.broadcast %cst_17 : f32 to vector<4x8x1xf32>
    %c0_18 = arith.constant 0 : index
    %c0_19 = arith.constant 0 : index
    %c0_20 = arith.constant 0 : index
    %31 = vector.load %arg8[%c0_18, %c0_19, %c0_20] : memref<4x8x1xf32, #tpu.memory_space<vmem>>, vector<4x8x1xf32>
    tpu.vector_store %arg8[%c0_18, %c0_19, %c0_20], %30 {strides = array<i32>} : memref<4x8x1xf32, #tpu.memory_space<vmem>>, vector<4x8x1xf32>,
    %cst_21 = arith.constant 0.000000e+00 : f32
    %32 = vector.broadcast %cst_21 : f32 to vector<4x8x1xf32>
    %c0_22 = arith.constant 0 : index
    %c0_23 = arith.constant 0 : index
    %c0_24 = arith.constant 0 : index
    %33 = vector.load %arg9[%c0_22, %c0_23, %c0_24] : memref<4x8x1xf32, #tpu.memory_space<vmem>>, vector<4x8x1xf32>
    tpu.vector_store %arg9[%c0_22, %c0_23, %c0_24], %32 {strides = array<i32>} : memref<4x8x1xf32, #tpu.memory_space<vmem>>, vector<4x8x1xf32>,
    %cst_25 = arith.constant 0.000000e+00 : f32
    %34 = vector.broadcast %cst_25 : f32 to vector<4x8x8xf32>
    %c0_26 = arith.constant 0 : index
    %c0_27 = arith.constant 0 : index
    %c0_28 = arith.constant 0 : index
    %35 = vector.load %arg10[%c0_26, %c0_27, %c0_28] : memref<4x8x8xf32, #tpu.memory_space<vmem>>, vector<4x8x8xf32>
    tpu.vector_store %arg10[%c0_26, %c0_27, %c0_28], %34 {strides = array<i32>} : memref<4x8x8xf32, #tpu.memory_space<vmem>>, vector<4x8x8xf32>,
    %36 = tpu.iota {dimensions = array<i32: 0>} : vector<8x8xi32>
    %37 = vector.broadcast %4 : i32 to vector<8x8xi32>
    %38 = arith.addi %37, %36 : vector<8x8xi32>
    %c1_i32 = arith.constant 1 : i32
    %39 = arith.addi %arg1, %c1_i32 : i32
    %c0_i32_29 = arith.constant 0 : i32
    %40 = arith.subi %39, %c0_i32_29 : i32
    %c1_i32_30 = arith.constant 1 : i32
    %c1_i32_31 = arith.constant 1 : i32
    %41 = arith.subi %c1_i32_30, %c1_i32_31 : i32
    %42 = arith.addi %40, %41 : i32
    %c1_i32_32 = arith.constant 1 : i32
    %43 = arith.divsi %42, %c1_i32_32 : i32
    %c1_i32_33 = arith.constant 1 : i32
    %c0_i32_34 = arith.constant 0 : i32
    %c0_i32_35 = arith.constant 0 : i32
    %44 = arith.subi %43, %c0_i32_35 : i32
    %45 = arith.addi %c0_i32_35, %44 : i32
    %c1_i32_36 = arith.constant 1 : i32
    scf.for %arg11 = %c0_i32_35 to %45 step %c1_i32_36  : i32 {
      %71 = arith.muli %arg11, %c1_i32_33 : i32
      %72 = arith.addi %c0_i32_34, %71 : i32
      %c8_i32_52 = arith.constant 8 : i32
      %73 = arith.muli %72, %c8_i32_52 : i32
      %74 = tpu.assume_multiple %73, 8 : i32
      %c0_53 = arith.constant 0 : index
      %75 = arith.index_cast %74 : i32 to index
      %c0_54 = arith.constant 0 : index
      %76 = vector.load %arg5[%c0_53, %75, %c0_54] : memref<4x8x8xbf16, #tpu.memory_space<vmem>>, vector<4x8x8xbf16>
      %c0_55 = arith.constant 0 : index
      %77 = arith.index_cast %74 : i32 to index
      %c0_56 = arith.constant 0 : index
      %78 = vector.load %arg6[%c0_55, %77, %c0_56] : memref<4x8x8xbf16, #tpu.memory_space<vmem>>, vector<4x8x8xbf16>
      "tpu.trace_start"() <{level = 10 : i32, message = "hqd,hkd->hqk"}> : () -> ()
      %cst_57 = arith.constant dense<0.000000e+00> : vector<4x8x8xf32>
      %79 = tpu.matmul %29, %76, %cst_57 {dimension_numbers = #tpu.dot_dimension_numbers<[2], [2], [1], [1], [0, 0, 0, 1, 1, 1], [0], [0]>} : vector<4x8x8xbf16>, vector<4x8x8xbf16>, vector<4x8x8xf32> -> vector<4x8x8xf32>
      "tpu.trace_stop"() : () -> ()
      %80 = tpu.iota {dimensions = array<i32: 1>} : vector<8x8xi32>
      %81 = vector.broadcast %74 : i32 to vector<8x8xi32>
      %82 = arith.addi %81, %80 : vector<8x8xi32>
      %83 = arith.cmpi sgt, %82, %38 : vector<8x8xi32>
      %84 = vector.shape_cast %83 : vector<8x8xi1> to vector<1x8x8xi1>
      %cst_58 = arith.constant -1.000000e+30 : f32
      %85 = vector.shape_cast %84 : vector<1x8x8xi1> to vector<1x8x8xi1>
      %86 = vector.broadcast %85 : vector<1x8x8xi1> to vector<4x8x8xi1>
      %87 = vector.broadcast %cst_58 : f32 to vector<4x8x8xf32>
      %88 = arith.select %86, %87, %79 : vector<4x8x8xi1>, vector<4x8x8xf32>
      %c0_59 = arith.constant 0 : index
      %c0_60 = arith.constant 0 : index
      %c0_61 = arith.constant 0 : index
      %89 = vector.load %arg8[%c0_59, %c0_60, %c0_61] : memref<4x8x1xf32, #tpu.memory_space<vmem>>, vector<4x8x1xf32>
      %cst_62 = arith.constant dense<0xFF800000> : vector<4x8xf32>
      %90 = vector.multi_reduction <maximumf>, %88, %cst_62 [2] : vector<4x8x8xf32> to vector<4x8xf32>
      %91 = vector.shape_cast %90 : vector<4x8xf32> to vector<4x8x1xf32>
      %92 = arith.maximumf %89, %91 : vector<4x8x1xf32>
      %93 = arith.subf %89, %92 : vector<4x8x1xf32>
      %94 = math.exp %93 : vector<4x8x1xf32>
      %95 = vector.broadcast %92 : vector<4x8x1xf32> to vector<4x8x8xf32>
      %96 = arith.subf %88, %95 : vector<4x8x8xf32>
      %97 = math.exp %96 : vector<4x8x8xf32>
      %c0_63 = arith.constant 0 : index
      %c0_64 = arith.constant 0 : index
      %c0_65 = arith.constant 0 : index
      %98 = vector.load %arg9[%c0_63, %c0_64, %c0_65] : memref<4x8x1xf32, #tpu.memory_space<vmem>>, vector<4x8x1xf32>
      %99 = arith.mulf %94, %98 : vector<4x8x1xf32>
      %cst_66 = arith.constant dense<0.000000e+00> : vector<4x8xf32>
      %100 = vector.multi_reduction <add>, %97, %cst_66 [2] : vector<4x8x8xf32> to vector<4x8xf32>
      %101 = vector.shape_cast %100 : vector<4x8xf32> to vector<4x8x1xf32>
      %102 = arith.addf %99, %101 : vector<4x8x1xf32>
      %c0_67 = arith.constant 0 : index
      %c0_68 = arith.constant 0 : index
      %c0_69 = arith.constant 0 : index
      %103 = vector.load %arg9[%c0_67, %c0_68, %c0_69] : memref<4x8x1xf32, #tpu.memory_space<vmem>>, vector<4x8x1xf32>
      tpu.vector_store %arg9[%c0_67, %c0_68, %c0_69], %102 {strides = array<i32>} : memref<4x8x1xf32, #tpu.memory_space<vmem>>, vector<4x8x1xf32>,
      %104 = arith.truncf %97 : vector<4x8x8xf32> to vector<4x8x8xbf16>
      "tpu.trace_start"() <{level = 10 : i32, message = "hqk,hkd->hqd"}> : () -> ()
      %cst_70 = arith.constant dense<0.000000e+00> : vector<4x8x8xf32>
      %105 = tpu.matmul %104, %78, %cst_70 {dimension_numbers = #tpu.dot_dimension_numbers<[2], [1], [1], [2], [0, 0, 0, 1, 1, 2], [0], [0]>} : vector<4x8x8xbf16>, vector<4x8x8xbf16>, vector<4x8x8xf32> -> vector<4x8x8xf32>
      "tpu.trace_stop"() : () -> ()
      %c0_71 = arith.constant 0 : index
      %c0_72 = arith.constant 0 : index
      %c0_73 = arith.constant 0 : index
      %106 = vector.load %arg10[%c0_71, %c0_72, %c0_73] : memref<4x8x8xf32, #tpu.memory_space<vmem>>, vector<4x8x8xf32>
      %107 = vector.broadcast %94 : vector<4x8x1xf32> to vector<4x8x8xf32>
      %108 = arith.mulf %107, %106 : vector<4x8x8xf32>
      %109 = arith.addf %108, %105 : vector<4x8x8xf32>
      %c0_74 = arith.constant 0 : index
      %c0_75 = arith.constant 0 : index
      %c0_76 = arith.constant 0 : index
      %110 = vector.load %arg10[%c0_74, %c0_75, %c0_76] : memref<4x8x8xf32, #tpu.memory_space<vmem>>, vector<4x8x8xf32>
      tpu.vector_store %arg10[%c0_74, %c0_75, %c0_76], %109 {strides = array<i32>} : memref<4x8x8xf32, #tpu.memory_space<vmem>>, vector<4x8x8xf32>,
      %c0_77 = arith.constant 0 : index
      %c0_78 = arith.constant 0 : index
      %c0_79 = arith.constant 0 : index
      %111 = vector.load %arg8[%c0_77, %c0_78, %c0_79] : memref<4x8x1xf32, #tpu.memory_space<vmem>>, vector<4x8x1xf32>
      tpu.vector_store %arg8[%c0_77, %c0_78, %c0_79], %92 {strides = array<i32>} : memref<4x8x1xf32, #tpu.memory_space<vmem>>, vector<4x8x1xf32>,
    }
    %c0_37 = arith.constant 0 : index
    %c0_38 = arith.constant 0 : index
    %c0_39 = arith.constant 0 : index
    %46 = vector.load %arg10[%c0_37, %c0_38, %c0_39] : memref<4x8x8xf32, #tpu.memory_space<vmem>>, vector<4x8x8xf32>
    %c0_40 = arith.constant 0 : index
    %c0_41 = arith.constant 0 : index
    %c0_42 = arith.constant 0 : index
    %47 = vector.load %arg9[%c0_40, %c0_41, %c0_42] : memref<4x8x1xf32, #tpu.memory_space<vmem>>, vector<4x8x1xf32>
    %48 = tpu.reciprocal %47 {approx = true} : vector<4x8x1xf32> -> vector<4x8x1xf32>
    %49 = vector.broadcast %48 : vector<4x8x1xf32> to vector<4x8x8xf32>
    %50 = arith.mulf %46, %49 : vector<4x8x8xf32>
    %51 = vector.extract_strided_slice %50 {offsets = [0, 0, 0], sizes = [1, 8, 8], strides = [1, 1, 1]} : vector<4x8x8xf32> to vector<1x8x8xf32>
    %52 = vector.shape_cast %51 : vector<1x8x8xf32> to vector<8x8xf32>
    %c0_43 = arith.constant 0 : index
    %c0_44 = arith.constant 0 : index
    %c0_45 = arith.constant 0 : index
    %53 = vector.load %arg4[%c0_43, %c0_44, %c0_45] : memref<1x8x32xf32, #tpu.memory_space<vmem>>, vector<1x8x8xf32>
    %54 = vector.shape_cast %53 : vector<1x8x8xf32> to vector<8x8xf32>
    %55 = vector.shape_cast %52 : vector<8x8xf32> to vector<1x8x8xf32>
    tpu.vector_store %arg4[%c0_43, %c0_44, %c0_45], %55 {strides = array<i32>} : memref<1x8x32xf32, #tpu.memory_space<vmem>>, vector<1x8x8xf32>,
    %56 = vector.extract_strided_slice %50 {offsets = [1, 0, 0], sizes = [1, 8, 8], strides = [1, 1, 1]} : vector<4x8x8xf32> to vector<1x8x8xf32>
    %57 = vector.shape_cast %56 : vector<1x8x8xf32> to vector<8x8xf32>
    %c0_46 = arith.constant 0 : index
    %c0_47 = arith.constant 0 : index
    %c8 = arith.constant 8 : index
    %58 = vector.load %arg4[%c0_46, %c0_47, %c8] : memref<1x8x32xf32, #tpu.memory_space<vmem>>, vector<1x8x8xf32>
    %59 = vector.shape_cast %58 : vector<1x8x8xf32> to vector<8x8xf32>
    %60 = vector.shape_cast %57 : vector<8x8xf32> to vector<1x8x8xf32>
    tpu.vector_store %arg4[%c0_46, %c0_47, %c8], %60 {strides = array<i32>} : memref<1x8x32xf32, #tpu.memory_space<vmem>>, vector<1x8x8xf32>,
    %61 = vector.extract_strided_slice %50 {offsets = [2, 0, 0], sizes = [1, 8, 8], strides = [1, 1, 1]} : vector<4x8x8xf32> to vector<1x8x8xf32>
    %62 = vector.shape_cast %61 : vector<1x8x8xf32> to vector<8x8xf32>
    %c0_48 = arith.constant 0 : index
    %c0_49 = arith.constant 0 : index
    %c16 = arith.constant 16 : index
    %63 = vector.load %arg4[%c0_48, %c0_49, %c16] : memref<1x8x32xf32, #tpu.memory_space<vmem>>, vector<1x8x8xf32>
    %64 = vector.shape_cast %63 : vector<1x8x8xf32> to vector<8x8xf32>
    %65 = vector.shape_cast %62 : vector<8x8xf32> to vector<1x8x8xf32>
    tpu.vector_store %arg4[%c0_48, %c0_49, %c16], %65 {strides = array<i32>} : memref<1x8x32xf32, #tpu.memory_space<vmem>>, vector<1x8x8xf32>,
    %66 = vector.extract_strided_slice %50 {offsets = [3, 0, 0], sizes = [1, 8, 8], strides = [1, 1, 1]} : vector<4x8x8xf32> to vector<1x8x8xf32>
    %67 = vector.shape_cast %66 : vector<1x8x8xf32> to vector<8x8xf32>
    %c0_50 = arith.constant 0 : index
    %c0_51 = arith.constant 0 : index
    %c24 = arith.constant 24 : index
    %68 = vector.load %arg4[%c0_50, %c0_51, %c24] : memref<1x8x32xf32, #tpu.memory_space<vmem>>, vector<1x8x8xf32>
    %69 = vector.shape_cast %68 : vector<1x8x8xf32> to vector<8x8xf32>
    %70 = vector.shape_cast %67 : vector<8x8xf32> to vector<1x8x8xf32>
    tpu.vector_store %arg4[%c0_50, %c0_51, %c24], %70 {strides = array<i32>} : memref<1x8x32xf32, #tpu.memory_space<vmem>>, vector<1x8x8xf32>,
    return
  }
  func.func @transform_0(%arg0: i32, %arg1: i32) -> (i32, i32, i32) {
    %c0_i32 = arith.constant 0 : i32
    %c0_i32_0 = arith.constant 0 : i32
    %c0_i32_1 = arith.constant 0 : i32
    return %arg0, %c0_i32, %c0_i32_0 : i32, i32, i32
  }
  func.func @transform_1(%arg0: i32, %arg1: i32) -> (i32, i32) {
    %c0_i32 = arith.constant 0 : i32
    %c0_i32_0 = arith.constant 0 : i32
    %c0_i32_1 = arith.constant 0 : i32
    return %c0_i32, %c0_i32_0 : i32, i32
  }
  func.func @transform_2(%arg0: i32, %arg1: i32) -> (i32, i32, i32) {
    %c0_i32 = arith.constant 0 : i32
    %c0_i32_0 = arith.constant 0 : i32
    return %arg0, %arg1, %c0_i32 : i32, i32, i32
  }
}

</mosaic_0001>

<bundles_post_ra>
// kernel: tpu_custom_call.1
= control target key start
LH: loop header
LB: loop body
LE: loop exit
PB: predicated region body
PF: predicated region fallthrough
CT: control target
= control target key end

     0   :  { %7 = vsyncpa [#allocation9], 0  ;;  %s1933_s0 = inlined_call_operand.hbm [shape: bf16[2,8,16], index: 0, kind: input, shape index: {}]   ;;  %s1934_s1 = inlined_call_operand.hbm [shape: bf16[16,96], index: 1, kind: input, shape index: {}]   ;;  %s1935_s2 = inlined_call_operand.hbm [shape: f32[2,8,32], index: 2, kind: output, shape index: {}]  }
   0x1   :  { %9 = vsyncpa [#allocation9 + $0x1], 0 }
   0x2   :  { %10 = vsyncpa [#allocation12], 0 }
   0x3   :  { %11 = vsyncpa [#allocation10], 0 }
   0x4   :  { %13 = vsyncpa [#allocation10 + $0x1], 0  ;;  %s1533_s9 = smov 0   ;;  %s1535_s10 = smov 0  }
   0x5   :  { %s1537_s11 = smov 0   ;;  %s1539_s12 = smov 0  }
   0x6   :  { %s1541_s13 = smov 0   ;;  %s1543_s14 = smov 0  }
   0x7 LB: > { %s1098_s15 = sadd.s32 4294967295, %s1490_s14   ;;  %s1099_s16 = sadd.s32 4294967294, %s1490_s14   ;;  %s1490_s14 = sphi %s1543_s14, %s19_s14   ;;  %s1486_s13 = sphi %s1541_s13, %s1959_s13   ;;  %s1482_s12 = sphi %s1539_s12, %s1958_s12   ;;  %s1478_s11 = sphi %s1537_s11, %s1957_s11   ;;  %s1474_s10 = sphi %s1535_s10, %s1956_s10   ;;  %s1470_s9 = sphi %s1533_s9, %s1955_s9  }
   0x8   : > { %p51_p0 = scmp.ne.s32.totalorder %s1474_s10, %s1470_s9  ;;  %p1567_p1 = scmp.eq.s32.totalorder %s1098_s15, 0 }
   0x9   : > { %p1571_p2 = scmp.eq.s32.totalorder %s1098_s15, 1  ;;  %p104_p3 = scmp.eq.s32.totalorder %s1099_s16, 1 }
   0xa   : > { %s1940_s17 = scalar_select %p1567_p1, 1, 0 }
   0xb   : > { %s1941_s18 = scalar_select %p1571_p2, 1, 0 }
   0xc   : > { %p1577_p4 = por %p1567_p1, %p51_p0  ;;  %p1100_p5 = scmp.ge.s32.totalorder %s1490_s14, 1 }
   0xd   : > { %p1582_p6 = por %p104_p3, %p51_p0  ;;  %p111_p7 = scmp.lt.s32.totalorder %s1490_s14, 3 }
   0xe   : > { %s1942_s19 = scalar_select %p1577_p4, 1, 0 }
   0xf   : > { %s1943_s20 = scalar_select %p1582_p6, 1, 0 }
  0x10   : > { %p1587_p8 = pnand %p1100_p5, %p111_p7  ;;  %s1496_s22 = smov [#allocation11]  }
  0x11   : > { %s123_s23 = sshll.u32 %s1496_s22, 4  ;;  %s31_s25 = sadd.s32 1, %s1486_s13  ;;  %s124_s23 = int_to_ptr.vmem [resolvable:$true] %s123_s23 }
  0x12   : > { %s1944_s21 = scalar_select %p1587_p8, 1, 0 }
  0x13   : > { %p1220_p9 = pneg %p1587_p8  ;;  %s1342_s28 = scalar_lea.hbm %s1934_s1, 128 }
  0x14   : > { %p1343_p12 = scmp.ne.s32.totalorder %s1934_s1, %s1342_s28  ;;  %p1349_p5 = scmp.lt.u32.totalorder %s1342_s28, %s1934_s1 }
  0x15   : > { %p1596_p11 = pnand %p1220_p9, %p1567_p1 }
  0x17   : > { %p1344_p13 = pneg %p1596_p11 }
  0x19   : > { %p1345_p0 = pnand %p1344_p13, %p1343_p12 }
  0x1b   : > { %p1346_p3 = pneg %p1345_p0 }
  0x1d   : > { %p1351_p7 = pnand %p1349_p5, %p1346_p3 }
  0x1f   : > { %1354 = shalt.err (!%p1351_p7)
}
  0x20   : > { %s1355_s5 = scalar_lea.vmem %s124_s23, 128  ;;  %p1363_p1 = scmp.lt.s32.totalorder %s124_s23, %s124_s23 }
  0x21   : > { %p1356_p9 = scmp.ne.s32.totalorder %s124_s23, %s1355_s5  ;;  %p1364_p4 = scmp.lt.s32.totalorder %s1355_s5, %s1355_s5 }
  0x23   : > { %p1358_p10 = pnand %p1356_p9, %p1344_p13  ;;  %p1365_p8 = por %p1364_p4, %p1363_p1 }
  0x25   : > { %p1359_p6 = pneg %p1358_p10 }
  0x27   : > { %p1366_p2 = pnand %p1365_p8, %p1359_p6 }
  0x29   : > { %1369 = shalt.err (!%p1366_p2)
}
  0x2a   : > { %s1497_s6 = smov 64   ;;  %s1498_s7 = smov 4  }
  0x2b   : > { %1223 = dma.hbm_to_vmem [thread:$0]  (!%p1596_p11), %s1934_s1, 128, %s124_s23, [#allocation12], %s1497_s6, %s1497_s6, %s1498_s7  }
  0x2c   : > { %p33_p1 = scmp.ge.s32.totalorder %s31_s25, 2  ;;  %s38_s16 = sadd.s32 1, %s1478_s11 }
  0x2d   : > { %p45_p2 = scmp.ne.s32.totalorder %s1478_s11, %s1474_s10  ;;  %p46_p4 = scmp.eq.s32.totalorder %s1490_s14, 0 }
  0x2e   : > { %s1961_s25 = smov (%p33_p1, %s31_s25), 0  ;;  %p1947_p8 = scmp.ne.s32.totalorder %s1941_s18, 0 }
  0x2f   : > { %p1623_p6 = por %p46_p4, %p45_p2  ;;  %s35_s24 = ssub.s32 %s1486_s13, %s1961_s25 }
  0x30   : > { %p1629_p10 = por %p1947_p8, %p45_p2  ;;  %p1233_p12 = scmp.lt.s32.totalorder %s1490_s14, 2 }
  0x31   : > { %p36_p11 = scmp.eq.s32.totalorder %s35_s24, 0  ;;  %s137_s23 = sand.u32 1, %s1478_s11  }
  0x32   : > { %s1103_s27 = sshll.u32 %s137_s23, 2  ;;  %s1104_s29 = sshll.u32 %s1486_s13, 6 }
  0x33   : > { %s1638_s28 = scalar_select %p36_p11, %s1478_s11, %s38_s16  }
  0x34   : > { %s1644_s4 = scalar_lea.hbm %s1933_s0, %s1104_s29  ;;  %s141_s18 = scalar_lea.vmem [#allocation8], %s1103_s27 }
  0x35   : > { %s148_s5 = sshll.u32 %s141_s18, 4  ;;  %p1650_p13 = pnand %p1233_p12, %p1623_p6  ;;  %s1646_s5 = int_to_ptr.vmem [resolvable:$true] %s148_s5 }
  0x36   : > { %s138_s7 = scalar_lea.sflag [#allocation9], %s137_s23  ;;  %s1370_s8 = scalar_lea.hbm %s1644_s4, 64 }
  0x37   : > { %p1371_p0 = scmp.ne.s32.totalorder %s1644_s4, %s1370_s8  ;;  %p1372_p3 = pneg %p1650_p13 }
  0x38   : > { %s1375_s24 = scalar_lea.hbm %s1933_s0, 128  ;;  %p1376_p9 = scmp.lt.u32.totalorder %s1644_s4, %s1933_s0 }
  0x39   : > { %p1373_p5 = pnand %p1372_p3, %p1371_p0  ;;  %p1377_p1 = scmp.lt.u32.totalorder %s1375_s24, %s1370_s8 }
  0x3a   : > { %p1379_p4 = scmp.lt.u32.totalorder %s1370_s8, %s1644_s4 }
  0x3b   : > { %p1374_p7 = pneg %p1373_p5  ;;  %p1378_p2 = por %p1377_p1, %p1376_p9 }
  0x3d   : > { %p1380_p6 = por %p1379_p4, %p1378_p2 }
  0x3f   : > { %p1381_p8 = pnand %p1380_p6, %p1374_p7 }
  0x41   : > { %1384 = shalt.err (!%p1381_p8)
}
  0x42   : > { %s1385_s23 = scalar_lea.vmem %s1646_s5, 64  ;;  %s1499_s29 = smov [#allocation8]  }
  0x43   : > { %p1386_p12 = scmp.ne.s32.totalorder %s1646_s5, %s1385_s23  ;;  %s1390_s30 = sshll.u32 %s1499_s29, 4  ;;  %s1391_s30 = int_to_ptr.vmem [resolvable:$false] %s1390_s30 }
  0x44   : > { %s1392_s3 = scalar_lea.vmem %s1391_s30, 128  ;;  %p1393_p5 = scmp.lt.s32.totalorder %s1646_s5, %s1391_s30 }
  0x45   : > { %p1388_p11 = pnand %p1386_p12, %p1372_p3  ;;  %p1394_p9 = scmp.lt.s32.totalorder %s1392_s3, %s1385_s23 }
  0x47   : > { %p1389_p0 = pneg %p1388_p11  ;;  %p1395_p1 = por %p1394_p9, %p1393_p5 }
  0x49   : > { %p1396_p2 = pnand %p1395_p1, %p1389_p0 }
  0x4b   : > { %1399 = shalt.err (!%p1396_p2)
}
  0x4c   : > { %1227 = dma.hbm_to_vmem [thread:$0]  (!%p1650_p13), %s1644_s4, 64, %s1646_s5, %s138_s7  }
  0x4d   : > { %p1950_p7 = scmp.ne.s32.totalorder %s1944_s21, 0 }
  0x4e   : > { %s1682_s18 = sand.u32 (!%p1950_p7), 1, %s1474_s10   ;;  %p1951_p3 = scmp.ne.s32.totalorder (!%p1950_p7), %s1942_s19, 0 }
  0x4f   : > { %157 = sbr.rel (%p1950_p7) target bundleno = 1549 (0x60d), region = 28  ;;  %s1106_s8 = sshll.u32 (!%p1950_p7), %s1682_s18, 2 }
  0x50   : > { %s160_s15 = scalar_lea.sflag (!%p1950_p7), [#allocation9], %s1682_s18  ;;  %s1686_s16 = scalar_lea.vmem (!%p1950_p7), [#allocation8], %s1106_s8 }
  0x56   : > { %1457 = dma.done.wait (%p1951_p3), %s160_s15, 64  }
  0x57   : > { %1459 = vsyncadd (%p1951_p3), %s160_s15, 4294967232  ;;  %p1952_p13 = scmp.ne.s32.totalorder %s1940_s17, 0 }
  0x59   : > { %1461 = dma.done.wait (%p1952_p13), [#allocation12], 128  }
  0x5a   : > { %1463 = vsyncadd (%p1952_p13), [#allocation12], 4294967168  ;;  %vm372_vm0 = vcmask 7168   ;;  %vm381_vm1 = vcmask 64512   ;;  %v1500_v0 = vmov 0.0   ;;  %s1108_s17 = sshll.u32 %s1682_s18, 3  ;;  %v386_v15 = vlaneseq }
  0x5b   : > { %1158 = vmatprep.subr.bf16.mxu1 %v1500_v0  ;;  %377 = vst.msk [vmem:[#allocation6] sm:$0xff] %vm372_vm0, %v1500_v0  ;;  %378 = vst.msk [vmem:[#allocation6 + $0x8] sm:$0xff] %vm372_vm0, %v1500_v0  ;;  %1152 = vmatprep.subr.bf16.mxu0 %v1500_v0  ;;  %v1501_v1 = vmov -1e+30   ;;  %vm1502_vm2 = vmmov 0   ;;  %v1312_v2 = vld [vmem:[#allocation11] sm:$0xff]  }
  0x5c   : > { %379 = vst.msk [vmem:[#allocation6 + $0x10] sm:$0xff] %vm372_vm0, %v1500_v0  ;;  %380 = vst.msk [vmem:[#allocation6 + $0x18] sm:$0xff] %vm372_vm0, %v1500_v0  ;;  %1160 = vmatprep.mubr.msk.bf16.mxu1 %vm1502_vm2, %v1500_v0  ;;  %1154 = vmatprep.mubr.msk.bf16.mxu0 %vm1502_vm2, %v1500_v0  ;;  %v1313_v3 = vld [vmem:[#allocation11] sm:$0xff]   ;;  %s1503_s19 = smov 96   ;;  %vm204_vm3 = vcmask 130048   ;;  %vm249_vm4 = vcmask 60416  }
  0x5d   : > { %382 = vst.msk [vmem:[#allocation7] sm:$0xff] %vm381_vm1, %v1500_v0  ;;  %383 = vst.msk [vmem:[#allocation7 + $0x8] sm:$0xff] %vm381_vm1, %v1500_v0  ;;  %201 = vrot.lane.b32.xlu0 %v1312_v2, %s1503_s19  ;;  %1159 = vmatpush3.bf16.msra.mxu1 %v1313_v3  ;;  %v293_v4 = vld [vmem:[%s1686_s16] sm:$0xf]  ;;  %s1504_s21 = smov 112   ;;  %s1505_s4 = smov 120  }
  0x5e   : > { %384 = vst.msk [vmem:[#allocation7 + $0x10] sm:$0xff] %vm381_vm1, %v1500_v0  ;;  %385 = vst.msk [vmem:[#allocation7 + $0x18] sm:$0xff] %vm381_vm1, %v1500_v0  ;;  %v193_v6 = vld [vmem:[%s1686_s16] sm:$0xf]  ;;  %s1506_s5 = smov 104   ;;  %v1716_v19 = vshrl.u32 %v386_v15, 7 }
  0x5f   : > { %373 = vst.msk [vmem:[#allocation5] sm:$0xff] %vm372_vm0, %v1501_v1  ;;  %374 = vst.msk [vmem:[#allocation5 + $0x8] sm:$0xff] %vm372_vm0, %v1501_v1  ;;  %s1507_s6 = smov 88   ;;  %s1508_s7 = smov 80  }
  0x60   : > { %375 = vst.msk [vmem:[#allocation5 + $0x10] sm:$0xff] %vm372_vm0, %v1501_v1  ;;  %376 = vst.msk [vmem:[#allocation5 + $0x18] sm:$0xff] %vm372_vm0, %v1501_v1  ;;  %1161 = vmatmul.mubr.msk.bf16.vlgmr.msra.gmra.mrb[0].mxu1 %vm204_vm3, %v293_v4  ;;  %s1509_s24 = smov 72   ;;  %s1738_s22 = scalar_lea.vmem [#allocation13], %s1108_s17 }
  0x61   : > { %s1740_s27 = smov 0  }
  0xcf   : > { %v202_v5 = vpop.permute.xlu0 %201 }
  0xd0   : > { %1153 = vmatpush3.bf16.msra.mxu0 %v202_v5 }
  0xd3   : > { %1155 = vmatmul.mubr.msk.bf16.vlgmr.msra.gmra.mrb[0].mxu0 %vm204_vm3, %v193_v6 }
 0x133   : > { %v340_v7 = vpop.f32.mrb[0].mxu1 }
 0x134   : > { %v346_v8 = vmul.f32 0.35355338, %v340_v7  ;;  %v1162_v9 = vpop.f32.mrb[1].mxu1 }
 0x135   : > { %v343_v10 = vpop.f32.mrb[2].mxu1 }
 0x136   : > { %v347_v11 = vpack.c.bf16 %v346_v8, %v346_v8  ;;  %v1163_v12 = vpop.f32.mrb[3].mxu1 }
 0x138   : > { %349 = vst.msk [vmem:[#allocation4] sm:$0xf] %vm249_vm4, %v347_v11  ;;  %358 = vrot.lane.b32.xlu1 %v347_v11, %s1504_s21  ;;  %353 = vrot.lane.b32.xlu0 %v347_v11, %s1505_s4 }
 0x13c   : > { %363 = vrot.lane.b32.xlu1 %v347_v11, %s1506_s5 }
 0x13f   : > { %v1713_v13 = vld [vmem:[#allocation4] sm:$0xf] }
 0x1a6   : > { %v242_v14 = vpop.f32.mrb[0].mxu0 }
 0x1a7   : > { %v248_v16 = vpack.c.bf16 %v242_v14, %v242_v14  ;;  %v1156_v17 = vpop.f32.mrb[1].mxu0 }
 0x1a8   : > { %v245_v18 = vpop.f32.mrb[2].mxu0 }
 0x1a9   : > { %250 = vst.msk [vmem:[#allocation2] sm:$0xf] %vm249_vm4, %v248_v16  ;;  %258 = vrot.lane.b32.xlu1 %v248_v16, %s1505_s4  ;;  %254 = vrot.lane.b32.xlu0 %v248_v16, %s1503_s19  ;;  %v1157_v20 = vpop.f32.mrb[3].mxu0 }
 0x1aa   : > { %v359_v21 = vpop.permute.xlu1 %358  ;;  %v354_v22 = vpop.permute.xlu0 %353 }
 0x1ab   : > { %362 = vst.msk [vmem:[#allocation4 + $0x8] sm:$0xf] %vm249_vm4, %v359_v21  ;;  %357 = vst.msk [vmem:[#allocation4 + $0x4] sm:$0xf] %vm249_vm4, %v354_v22 }
 0x1ad   : > { %268 = vrot.lane.b32.xlu1 %v248_v16, %s1504_s21  ;;  %263 = vrot.lane.b32.xlu0 %v248_v16, %s1507_s6 }
 0x1ae   : > { %v364_v23 = vpop.permute.xlu1 %363 }
 0x1af   : > { %367 = vst.msk [vmem:[#allocation4 + $0xc] sm:$0xf] %vm249_vm4, %v364_v23 }
 0x1b1   : > { %278 = vrot.lane.b32.xlu1 %v248_v16, %s1506_s5  ;;  %273 = vrot.lane.b32.xlu0 %v248_v16, %s1508_s7 }
 0x1b2   : > { %v1723_v24 = vld [vmem:[#allocation4 + $0x8] sm:$0xf]  ;;  %v1725_v25 = vld [vmem:[#allocation4 + $0x4] sm:$0xf] }
 0x1b5   : > { %283 = vrot.lane.b32.xlu0 %v248_v16, %s1509_s24 }
 0x1b6   : > { %v1727_v26 = vld [vmem:[#allocation4 + $0xc] sm:$0xf] }
 0x21b   : > { %v259_v27 = vpop.permute.xlu1 %258  ;;  %v255_v28 = vpop.permute.xlu0 %254 }
 0x21c   : > { %262 = vst.msk [vmem:[#allocation2 + $0x4] sm:$0xf] %vm249_vm4, %v259_v27  ;;  %257 = vst.msk [vmem:[#allocation3] sm:$0xf] %vm249_vm4, %v255_v28 }
 0x21f   : > { %v269_v29 = vpop.permute.xlu1 %268  ;;  %v264_v30 = vpop.permute.xlu0 %263 }
 0x220   : > { %272 = vst.msk [vmem:[#allocation2 + $0x8] sm:$0xf] %vm249_vm4, %v269_v29  ;;  %267 = vst.msk [vmem:[#allocation3 + $0x4] sm:$0xf] %vm249_vm4, %v264_v30 }
 0x223   : > { %v279_v31 = vpop.permute.xlu1 %278  ;;  %v274_v32 = vpop.permute.xlu0 %273 }
 0x224   : > { %282 = vst.msk [vmem:[#allocation2 + $0xc] sm:$0xf] %vm249_vm4, %v279_v31  ;;  %277 = vst.msk [vmem:[#allocation3 + $0x8] sm:$0xf] %vm249_vm4, %v274_v32 }
 0x227   : > { %v284_v33 = vpop.permute.xlu0 %283 }
 0x228   : > { %287 = vst.msk [vmem:[#allocation3 + $0xc] sm:$0xf] %vm249_vm4, %v284_v33 }
 0x229 LB: >> { %v1510_v34 = vmov 0.0   ;;  %s1115_s23 = sshll.u32 %s1494_s27, 3  ;;  %vm1511_vm5 = vmmov 0   ;;  %v597_v43 = vand.u32 127, %v386_v15  ;;  %v1512_v6 = vmov 0   ;;  %v607_v7 = vld [vmem:[#allocation5] sm:$0xff]  ;;  %s1494_s27 = sphi %s1740_s27, %s394_s27  }
 0x22a   : >> { %1164 = vmatprep.subr.bf16.mxu0 %v1510_v34  ;;  %1170 = vmatprep.subr.bf16.mxu1 %v1510_v34  ;;  %s1754_s29 = sshra.s32 %s1115_s23, 3  ;;  %v598_v44 = vstv %s1115_s23  ;;  %v1811_v10 = vld [vmem:[#allocation5 + $0x8] sm:$0xff]  ;;  %v609_v17 = vld [vmem:[#allocation5 + $0x10] sm:$0xff]  ;;  %v1822_v22 = vld [vmem:[#allocation5 + $0x18] sm:$0xff]  ;;  %vm706_vm7 = vcmask 1043456   ;;  %s394_s27 = sadd.s32 1, %s1494_s27  }
 0x22b   : >> { %1166 = vmatprep.mubr.msk.bf16.mxu0 %vm1511_vm5, %v1510_v34  ;;  %1172 = vmatprep.mubr.msk.bf16.mxu1 %vm1511_vm5, %v1510_v34  ;;  %s1116_s30 = sshll.u32 %s1754_s29, 2  ;;  %v599_v45 = vadd.s32 %v598_v44, %v597_v43  ;;  %p393_p4 = scmp.ge.s32.totalorder %s394_s27, 1 }
 0x22c   : >> { %s401_s3 = scalar_lea.vmem [#allocation2], %s1116_s30  ;;  %1314 = vset.pattern.permute.xlu0 %v1512_v6  ;;  %1315 = vset.pattern.permute.xlu1 %v1512_v6  ;;  %s407_s8 = scalar_lea.vmem [#allocation3], %s1116_s30  ;;  %v671_v6 = vld [vmem:[#allocation6] sm:$0xff]  ;;  %vm969_vm8 = vcmask (%p393_p4), 130112   ;;  %vm975_vm9 = vcmask (%p393_p4), 195712   ;;  %vm981_vm10 = vcmask (%p393_p4), 261312  }
 0x22d   : >> { %v402_v35 = vld [vmem:[%s401_s3] sm:$0xf]  ;;  %v403_v36 = vld [vmem:[%s401_s3 + $0x4] sm:$0xf]  ;;  %v404_v39 = vld [vmem:[%s401_s3 + $0x8] sm:$0xf]  ;;  %vm600_vm6 = vcmp.gt.s32.totalorder %v599_v45, %v1716_v19 }
 0x22e   : >> { %v416_v37 = vsel %vm381_vm1, %v402_v35, 0  ;;  %v462_v38 = vsel %vm381_vm1, %v403_v36, 0  ;;  %v405_v40 = vld [vmem:[%s401_s3 + $0xc] sm:$0xf]  ;;  %v508_v41 = vsel %vm381_vm1, %v404_v39, 0  ;;  %s1514_s15 = smov (%p393_p4), 8  }
 0x22f   : >> { %1165 = vmatpush3.bf16.xpose.msra.mxu0 %v416_v37  ;;  %1171 = vmatpush3.bf16.xpose.msra.mxu1 %v462_v38  ;;  %v554_v42 = vsel %vm381_vm1, %v405_v40, 0  ;;  %v408_v30 = vld [vmem:[%s407_s8] sm:$0xf]  ;;  %v409_v33 = vld [vmem:[%s407_s8 + $0x4] sm:$0xf]  ;;  %s1515_s16 = smov (%p393_p4), 16  }
 0x230   : >> { %1176 = vmatprep.subr.bf16.mxu0 %v1510_v34  ;;  %1182 = vmatprep.subr.bf16.mxu1 %v1510_v34  ;;  %v708_v31 = vsel %vm706_vm7, %v408_v30, 0  ;;  %v754_v35 = vsel %vm706_vm7, %v409_v33, 0  ;;  %v410_v36 = vld [vmem:[%s407_s8 + $0x8] sm:$0xf]  ;;  %v411_v38 = vld [vmem:[%s407_s8 + $0xc] sm:$0xf] }
 0x231   : >> { %v800_v37 = vsel %vm706_vm7, %v410_v36, 0  ;;  %v846_v39 = vsel %vm706_vm7, %v411_v38, 0  ;;  %s1516_s17 = smov (%p393_p4), 24   ;;  %s1127_s19 = sshll.u32 (%p393_p4), %s1482_s12, 7 }
 0x232   : > { %s998_s21 = sshll.u32 (%p393_p4), %s1738_s22, 4  ;;  %s1882_s6 = scalar_lea.hbm (%p393_p4), %s1935_s2, %s1127_s19  ;;  %s1884_s21 = int_to_ptr.vmem [resolvable:$true] %s998_s21 }
 0x233   : > { %s984_s7 = scalar_lea.sflag (%p393_p4), [#allocation10], %s1682_s18  ;;  %s1400_s24 = scalar_lea.vmem (%p393_p4), %s1884_s21, 128 }
 0x234   : > { %p1401_p6 = scmp.ne.s32.totalorder (%p393_p4), %s1884_s21, %s1400_s24  ;;  %s1517_s12 = smov (%p393_p4), [#allocation13]  }
 0x235   : > { %s1404_s27 = sshll.u32 (%p393_p4), %s1517_s12, 4  ;;  %s1405_s27 = int_to_ptr.vmem [resolvable:$false] %s1404_s27 }
 0x236   : >> { %1167 = vmatmul.mubr.msk.bf16.vlgmr.msra.gmra.mrb[0].mxu0 %vm381_vm1, %v1713_v13  ;;  %1173 = vmatmul.mubr.msk.bf16.vlgmr.msra.gmra.mrb[0].mxu1 %vm381_vm1, %v1725_v25  ;;  %p1402_p8 = pnand (%p393_p4), %p1401_p6, %p1629_p10  ;;  %s1406_s23 = scalar_lea.vmem (%p393_p4), %s1405_s27, 256 }
 0x237   : >> { %1177 = vmatpush3.bf16.xpose.msra.mxu0 %v508_v41  ;;  %1183 = vmatpush3.bf16.xpose.msra.mxu1 %v554_v42  ;;  %p1407_p11 = scmp.lt.s32.totalorder (%p393_p4), %s1884_s21, %s1405_s27  ;;  %p1408_p0 = scmp.lt.s32.totalorder (%p393_p4), %s1406_s23, %s1400_s24 }
 0x238   : >> { %1178 = vmatprep.mubr.msk.bf16.mxu0 %vm1511_vm5, %v1510_v34  ;;  %1184 = vmatprep.mubr.msk.bf16.mxu1 %vm1511_vm5, %v1510_v34  ;;  %p1403_p12 = pneg (%p393_p4), %p1402_p8 }
 0x239   : >> { %1188 = vmatprep.subr.bf16.mxu0 %v1510_v34  ;;  %1194 = vmatprep.subr.bf16.mxu1 %v1510_v34  ;;  %p1409_p5 = por (%p393_p4), %p1408_p0, %p1407_p11 }
 0x23b   : > { %p1410_p9 = pnand (%p393_p4), %p1409_p5, %p1403_p12 }
 0x23e   : >> { %1179 = vmatmul.mubr.msk.bf16.vlgmr.msra.gmra.mrb[4].mxu0 %vm381_vm1, %v1723_v24  ;;  %1185 = vmatmul.mubr.msk.bf16.vlgmr.msra.gmra.mrb[4].mxu1 %vm381_vm1, %v1727_v26 }
 0x23f   : >> { %1190 = vmatprep.mubr.msk.bf16.mxu0 %vm1511_vm5, %v1510_v34  ;;  %1196 = vmatprep.mubr.msk.bf16.mxu1 %vm1511_vm5, %v1510_v34 }
 0x240   : >> { %1189 = vmatpush3.bf16.msra.mxu0 %v708_v31  ;;  %1195 = vmatpush3.bf16.msra.mxu1 %v754_v35  ;;  %v889_v31 = vld [vmem:[#allocation7 + $0x8] sm:$0xff] }
 0x241   : >> { %1200 = vmatprep.subr.bf16.mxu0 %v1510_v34  ;;  %1206 = vmatprep.subr.bf16.mxu1 %v1510_v34 }
 0x309   : >> { %v452_v46 = vpop.f32.mrb[0].mxu0  ;;  %v498_v47 = vpop.f32.mrb[0].mxu1 }
 0x30a   : >> { %v1789_v48 = vsel %vm600_vm6, -1e+30, %v452_v46  ;;  %v1168_v49 = vpop.f32.mrb[1].mxu0  ;;  %v1793_v50 = vsel %vm600_vm6, -1e+30, %v498_v47  ;;  %v1174_v51 = vpop.f32.mrb[1].mxu1 }
 0x30b   : >> { %v455_v52 = vpop.f32.mrb[2].mxu0  ;;  %v611_v53 = vsel %vm381_vm1, %v1789_v48, -inf  ;;  %v501_v54 = vpop.f32.mrb[2].mxu1  ;;  %v614_v57 = vsel %vm381_vm1, %v1793_v50, -inf }
 0x30c   : >> { %612 = vmax.xlane.f32.xlu0 %v611_v53  ;;  %v1169_v55 = vpop.f32.mrb[3].mxu0  ;;  %v1175_v56 = vpop.f32.mrb[3].mxu1 }
 0x310   : >> { %615 = vmax.xlane.f32.xlu0 %v614_v57 }
 0x311   : >> { %v544_v58 = vpop.f32.mrb[4].mxu0  ;;  %v590_v59 = vpop.f32.mrb[4].mxu1 }
 0x312   : >> { %v1801_v60 = vsel %vm600_vm6, -1e+30, %v544_v58  ;;  %v1180_v61 = vpop.f32.mrb[5].mxu0  ;;  %v1805_v62 = vsel %vm600_vm6, -1e+30, %v590_v59  ;;  %v1186_v63 = vpop.f32.mrb[5].mxu1 }
 0x313   : >> { %v547_v0 = vpop.f32.mrb[6].mxu0  ;;  %v617_v1 = vsel %vm381_vm1, %v1801_v60, -inf  ;;  %v593_v2 = vpop.f32.mrb[6].mxu1  ;;  %v620_v5 = vsel %vm381_vm1, %v1805_v62, -inf }
 0x314   : >> { %618 = vmax.xlane.f32.xlu1 %v617_v1  ;;  %v1181_v3 = vpop.f32.mrb[7].mxu0  ;;  %v1187_v4 = vpop.f32.mrb[7].mxu1 }
 0x318   : >> { %621 = vmax.xlane.f32.xlu1 %v620_v5 }
 0x399   : >> { %v613_v8 = vpop.xlane.xlu0 %612 }
 0x39a   : >> { %v623_v9 = vmax.f32 %v607_v7, %v613_v8 }
 0x39c   : >> { %v627_v11 = vsub.f32 %v607_v7, %v623_v9  ;;  %924 = vst.msk [vmem:[#allocation5] sm:$0xff] %vm372_vm0, %v623_v9  ;;  %641 = vperm.xlu0 %1314, %v623_v9   ;;  %v672_v9 = vld [vmem:[#allocation6 + $0x8] sm:$0xff] }
 0x39d   : >> { %v616_v12 = vpop.xlane.xlu0 %615 }
 0x39e   : >> { %v631_v14 = vmul.f32 1.442695, %v627_v11  ;;  %v1815_v16 = vmax.f32 %v1811_v10, %v616_v12 }
 0x3a0   : >> { %1316 = vpow2.f32 %v631_v14  ;;  %v628_v18 = vsub.f32 %v1811_v10, %v1815_v16  ;;  %925 = vst.msk [vmem:[#allocation5 + $0x8] sm:$0xff] %vm372_vm0, %v1815_v16  ;;  %646 = vperm.xlu1 %1315, %v1815_v16  }
 0x3a1   : >> { %v619_v20 = vpop.xlane.xlu1 %618 }
 0x3a2   : >> { %v625_v21 = vmax.f32 %v609_v17, %v619_v20 }
 0x3a4   : >> { %v629_v23 = vsub.f32 %v609_v17, %v625_v21  ;;  %926 = vst.msk [vmem:[#allocation5 + $0x10] sm:$0xff] %vm372_vm0, %v625_v21  ;;  %651 = vperm.xlu1 %1315, %v625_v21   ;;  %v673_v17 = vld [vmem:[#allocation6 + $0x10] sm:$0xff]  ;;  %v674_v21 = vld [vmem:[#allocation6 + $0x18] sm:$0xff] }
 0x3a5   : >> { %v622_v27 = vpop.xlane.xlu1 %621 }
 0x3a6   : >> { %v1826_v28 = vmax.f32 %v1822_v22, %v622_v27  ;;  %v635_v56 = vmul.f32 1.442695, %v629_v23 }
 0x3a8   : >> { %v630_v29 = vsub.f32 %v1822_v22, %v1826_v28  ;;  %927 = vst.msk [vmem:[#allocation5 + $0x18] sm:$0xff] %vm372_vm0, %v1826_v28  ;;  %656 = vperm.xlu1 %1315, %v1826_v28  }
 0x3aa   : >> { %v1835_v32 = vpop.eup %1316  ;;  %v637_v3 = vmul.f32 1.442695, %v630_v29  ;;  %v888_v29 = vld [vmem:[#allocation7] sm:$0xff] }
 0x3ab   : >> { %v675_v7 = vmul.f32 %v1835_v32, %v671_v6 }
 0x3ac   : >> { %894 = vperm.xlu1 %1315, %v1835_v32  }
 0x41b   : >> { %v642_v40 = vpop.permute.xlu0 %641 }
 0x41c   : >> { %v659_v41 = vsub.f32 %v1789_v48, %v642_v40  ;;  %v890_v40 = vld [vmem:[#allocation7 + $0x10] sm:$0xff] }
 0x41e   : >> { %v663_v42 = vmul.f32 1.442695, %v659_v41 }
 0x41f   : >> { %v647_v43 = vpop.permute.xlu1 %646 }
 0x420   : >> { %1318 = vpow2.f32 %v663_v42  ;;  %v660_v44 = vsub.f32 %v1793_v50, %v647_v43 }
 0x422   : >> { %v665_v45 = vmul.f32 1.442695, %v660_v44 }
 0x423   : >> { %v652_v46 = vpop.permute.xlu1 %651 }
 0x424   : >> { %1320 = vpow2.f32 %v665_v45  ;;  %v661_v47 = vsub.f32 %v1801_v60, %v652_v46 }
 0x426   : >> { %v667_v49 = vmul.f32 1.442695, %v661_v47  ;;  %v891_v47 = vld [vmem:[#allocation7 + $0x18] sm:$0xff] }
 0x427   : >> { %v657_v51 = vpop.permute.xlu1 %656 }
 0x428   : >> { %1322 = vpow2.f32 %v667_v49  ;;  %v662_v52 = vsub.f32 %v1805_v62, %v657_v51  ;;  %v633_v62 = vmul.f32 1.442695, %v628_v18 }
 0x42a   : >> { %v1319_v53 = vpop.eup %1318  ;;  %v669_v54 = vmul.f32 1.442695, %v662_v52 }
 0x42b   : >> { %v679_v55 = vsel %vm381_vm1, %v1319_v53, 0.0  ;;  %v699_v48 = vpack.c.bf16 %v1319_v53, %v1319_v53  ;;  %v895_v5 = vpop.permute.xlu1 %894 }
 0x42c   : >> { %1324 = vpow2.f32 %v669_v54  ;;  %680 = vadd.xlane.f32.xlu1 %v679_v55  ;;  %v912_v30 = vmul.f32 %v895_v5, %v888_v29 }
 0x42d   : >> { %1191 = vmatmul.mubr.msk.bf16.vlgmr.msra.gmra.mrb[8].mxu0 %vm381_vm1, %v699_v48  ;;  %1326 = vpow2.f32 %v635_v56 }
 0x42e   : >> { %v1321_v50 = vpop.eup %1320  ;;  %1201 = vmatpush3.bf16.msra.mxu0 %v800_v37  ;;  %1202 = vmatprep.mubr.msk.bf16.mxu0 %vm1511_vm5, %v1510_v34  ;;  %1328 = vpow2.f32 %v633_v62 }
 0x42f   : >> { %v682_v57 = vsel %vm381_vm1, %v1321_v50, 0.0  ;;  %v700_v58 = vpack.c.bf16 %v1321_v50, %v1321_v50  ;;  %1330 = vpow2.f32 %v637_v3 }
 0x430   : >> { %683 = vadd.xlane.f32.xlu0 %v682_v57 }
 0x431   : >> { %1197 = vmatmul.mubr.msk.bf16.vlgmr.msra.gmra.mrb[8].mxu1 %vm381_vm1, %v700_v58 }
 0x432   : >> { %v1323_v59 = vpop.eup %1322  ;;  %1207 = vmatpush3.bf16.msra.mxu1 %v846_v39  ;;  %1208 = vmatprep.mubr.msk.bf16.mxu1 %vm1511_vm5, %v1510_v34 }
 0x433   : >> { %v701_v60 = vpack.c.bf16 %v1323_v59, %v1323_v59  ;;  %v685_v2 = vsel %vm381_vm1, %v1323_v59, 0.0 }
 0x435   : >> { %1203 = vmatmul.mubr.msk.bf16.vlgmr.msra.gmra.mrb[12].mxu0 %vm381_vm1, %v701_v60 }
 0x436   : >> { %v1325_v61 = vpop.eup %1324 }
 0x437   : >> { %v702_v63 = vpack.c.bf16 %v1325_v61, %v1325_v61  ;;  %v1327_v0 = vpop.eup %1326  ;;  %v688_v34 = vsel %vm381_vm1, %v1325_v61, 0.0 }
 0x438   : >> { %v1329_v1 = vpop.eup %1328  ;;  %v677_v18 = vmul.f32 %v1327_v0, %v673_v17 }
 0x439   : >> { %1209 = vmatmul.mubr.msk.bf16.vlgmr.msra.gmra.mrb[12].mxu1 %vm381_vm1, %v702_v63  ;;  %v1331_v4 = vpop.eup %1330  ;;  %v676_v11 = vmul.f32 %v1329_v1, %v672_v9  ;;  %v1513_v63 = vmov (%p393_p4), 0  }
 0x43a   : >> { %v678_v23 = vmul.f32 %v1331_v4, %v674_v21 }
 0x43d   : >> { %904 = vperm.xlu1 %1315, %v1327_v0  }
 0x446   : >> { %899 = vperm.xlu0 %1314, %v1329_v1  }
 0x44a   : > { %1332 = vset.pattern.permute.xlu0 (%p393_p4), %v1513_v63 }
 0x461   : >> { %686 = vadd.xlane.f32.xlu1 %v685_v2 }
 0x465   : >> { %689 = vadd.xlane.f32.xlu1 %v688_v34 }
 0x476   : >> { %909 = vperm.xlu1 %1315, %v1331_v4  }
 0x47a   : > { %1333 = vset.pattern.permute.xlu1 (%p393_p4), %v1513_v63 }
 0x4b9   : >> { %v681_v8 = vpop.xlane.xlu1 %680 }
 0x4ba   : >> { %v691_v10 = vadd.f32 %v681_v8, %v675_v7 }
 0x4bc   : >> { %695 = vst.msk [vmem:[#allocation6] sm:$0xff] %vm372_vm0, %v691_v10 }
 0x4bd   : >> { %v684_v12 = vpop.xlane.xlu0 %683  ;;  %v905_v16 = vpop.permute.xlu1 %904 }
 0x4be   : >> { %v692_v14 = vadd.f32 %v684_v12, %v676_v11  ;;  %v914_v45 = vmul.f32 %v905_v16, %v890_v40 }
 0x4c0   : >> { %696 = vst.msk [vmem:[#allocation6 + $0x8] sm:$0xff] %vm372_vm0, %v692_v14 }
 0x4c3   : > { %v932_v0 = vld [vmem:[#allocation6] sm:$0xff] (%p393_p4) }
 0x4c5   : >> { %v900_v32 = vpop.permute.xlu0 %899 }
 0x4c6   : >> { %v913_v38 = vmul.f32 %v900_v32, %v889_v31 }
 0x4c7   : > { %v933_v60 = vld [vmem:[#allocation6 + $0x8] sm:$0xff] (%p393_p4) }
 0x4c8   : > { %1334 = vrcp.f32 (%p393_p4), %v933_v60 }
 0x4d2   : > { %v1335_v1 = vpop.eup (%p393_p4), %1334 }
 0x4d3   : > { %947 = vperm.xlu0 (%p393_p4), %1332, %v1335_v1  }
 0x4ee   : >> { %v687_v20 = vpop.xlane.xlu1 %686 }
 0x4ef   : >> { %v693_v22 = vadd.f32 %v687_v20, %v677_v18 }
 0x4f1   : >> { %697 = vst.msk [vmem:[#allocation6 + $0x10] sm:$0xff] %vm372_vm0, %v693_v22 }
 0x4f2   : >> { %v690_v27 = vpop.xlane.xlu1 %689 }
 0x4f3   : >> { %v694_v28 = vadd.f32 %v690_v27, %v678_v23 }
 0x4f5   : >> { %698 = vst.msk [vmem:[#allocation6 + $0x18] sm:$0xff] %vm372_vm0, %v694_v28 }
 0x4f6   : >> { %v910_v49 = vpop.permute.xlu1 %909 }
 0x4f7   : >> { %v915_v55 = vmul.f32 %v910_v49, %v891_v47 }
 0x4f8   : > { %v934_v62 = vld [vmem:[#allocation6 + $0x10] sm:$0xff] (%p393_p4) }
 0x4fc   : > { %v935_v61 = vld [vmem:[#allocation6 + $0x18] sm:$0xff] (%p393_p4) }
 0x4fd   : > { %1336 = vrcp.f32 (%p393_p4), %v935_v61 }
 0x4fe   : > { %1338 = vrcp.f32 (%p393_p4), %v934_v62 }
 0x4ff   : > { %1340 = vrcp.f32 (%p393_p4), %v932_v0 }
 0x500   : >> { %v744_v33 = vpop.f32.mrb[8].mxu0 }
 0x501   : >> { %v916_v35 = vadd.f32 %v912_v30, %v744_v33  ;;  %v1192_v36 = vpop.f32.mrb[9].mxu0 }
 0x502   : >> { %v747_v37 = vpop.f32.mrb[10].mxu0 }
 0x503   : >> { %920 = vst.msk [vmem:[#allocation7] sm:$0xff] %vm381_vm1, %v916_v35  ;;  %v1193_v39 = vpop.f32.mrb[11].mxu0 }
 0x504   : >> { %v790_v41 = vpop.f32.mrb[8].mxu1 }
 0x505   : >> { %v917_v42 = vadd.f32 %v913_v38, %v790_v41  ;;  %v1198_v43 = vpop.f32.mrb[9].mxu1 }
 0x506   : >> { %v793_v44 = vpop.f32.mrb[10].mxu1 }
 0x507   : >> { %921 = vst.msk [vmem:[#allocation7 + $0x8] sm:$0xff] %vm381_vm1, %v917_v42  ;;  %v1199_v46 = vpop.f32.mrb[11].mxu1  ;;  %v1337_v2 = vpop.eup (%p393_p4), %1336 }
 0x508   : >> { %v836_v51 = vpop.f32.mrb[12].mxu0  ;;  %v1339_v34 = vpop.eup (%p393_p4), %1338  ;;  %957 = vperm.xlu1 (%p393_p4), %1333, %v1337_v2  }
 0x509   : >> { %v918_v52 = vadd.f32 %v914_v45, %v836_v51  ;;  %v1204_v53 = vpop.f32.mrb[13].mxu0  ;;  %396 = sbr.rel (!%p393_p4) target bundleno = 553 (0x229), region = 100  ;;  %v1341_v3 = vpop.eup (%p393_p4), %1340  ;;  %952 = vperm.xlu0 (%p393_p4), %1332, %v1339_v34  }
 0x50a   : >> { %v839_v54 = vpop.f32.mrb[14].mxu0  ;;  %v928_v5 = vld [vmem:[#allocation7] sm:$0xff] (%p393_p4) }
 0x50b   : >> { %922 = vst.msk [vmem:[#allocation7 + $0x10] sm:$0xff] %vm381_vm1, %v918_v52  ;;  %v1205_v48 = vpop.f32.mrb[15].mxu0 }
 0x50c   : >> { %v882_v50 = vpop.f32.mrb[12].mxu1  ;;  %942 = vperm.xlu1 (%p393_p4), %1333, %v1341_v3  }
 0x50d   : >> { %v919_v56 = vadd.f32 %v915_v55, %v882_v50  ;;  %v1210_v57 = vpop.f32.mrb[13].mxu1 }
 0x50e   : >> { %v885_v58 = vpop.f32.mrb[14].mxu1  ;;  %v929_v4 = vld [vmem:[#allocation7 + $0x8] sm:$0xff] (%p393_p4) }
 0x50f   : >> { %923 = vst.msk [vmem:[#allocation7 + $0x18] sm:$0xff] %vm381_vm1, %v919_v56  ;;  %v1211_v59 = vpop.f32.mrb[15].mxu1 }
 0x512   : > { %v930_v25 = vld [vmem:[#allocation7 + $0x10] sm:$0xff] }
 0x516   : > { %v931_v15 = vld [vmem:[#allocation7 + $0x18] sm:$0xff] }
 0x552   : > { %v948_v13 = vpop.permute.xlu0 %947 }
 0x553   : > { %v961_v19 = vmul.f32 %v948_v13, %v929_v4 }
 0x555   : > { %966 = vrot.lane.b32.xlu0 %v961_v19, %s1514_s15 }
 0x587   : > { %v958_v24 = vpop.permute.xlu1 %957 }
 0x588   : > { %v963_v26 = vmul.f32 %v958_v24, %v931_v15  ;;  %v953_v6 = vpop.permute.xlu0 %952 }
 0x589   : > { %v962_v7 = vmul.f32 %v953_v6, %v930_v25 }
 0x58a   : > { %978 = vrot.lane.b32.xlu0 %v963_v26, %s1516_s17 }
 0x58b   : > { %v943_v8 = vpop.permute.xlu1 %942  ;;  %972 = vrot.lane.b32.xlu1 %v962_v7, %s1515_s16 }
 0x58c   : > { %v960_v9 = vmul.f32 %v943_v8, %v928_v5 }
 0x58e   : > { %964 = vst.msk [vmem:[%s1738_s22] sm:$0xff] %vm381_vm1, %v960_v9 }
 0x5c7   : > { %v967_v10 = vpop.permute.xlu0 %966 }
 0x5c8   : > { %970 = vst.msk [vmem:[%s1738_s22] sm:$0xff] %vm969_vm8, %v967_v10 }
 0x5fc   : > { %v979_v12 = vpop.permute.xlu0 %978 }
 0x5fd   : > { %v973_v11 = vpop.permute.xlu1 %972 }
 0x5fe   : > { %976 = vst.msk [vmem:[%s1738_s22] sm:$0xff] %vm975_vm9, %v973_v11 }
 0x5ff   : > { %982 = vst.msk [vmem:[%s1738_s22] sm:$0xff] %vm981_vm10, %v979_v12 }
 0x600   : > { %1413 = shalt.err (!%p1410_p9)
}
 0x601   : > { %s1414_s18 = scalar_lea.hbm %s1882_s6, 128  ;;  %s1418_s30 = scalar_lea.hbm %s1935_s2, 256 }
 0x602   : > { %p1415_p1 = scmp.ne.s32.totalorder %s1882_s6, %s1414_s18  ;;  %p1419_p3 = scmp.lt.u32.totalorder %s1882_s6, %s1935_s2 }
 0x603   : > { %p1420_p13 = scmp.lt.u32.totalorder %s1418_s30, %s1414_s18  ;;  %p1422_p6 = scmp.lt.u32.totalorder %s1414_s18, %s1882_s6 }
 0x604   : > { %p1416_p2 = pnand %p1415_p1, %p1629_p10 }
 0x605   : > { %p1421_p4 = por %p1420_p13, %p1419_p3 }
 0x606   : > { %p1417_p7 = pneg %p1416_p2 }
 0x607   : > { %p1423_p8 = por %p1422_p6, %p1421_p4 }
 0x609   : > { %p1424_p12 = pnand %p1423_p8, %p1417_p7 }
 0x60b   : > { %1427 = shalt.err (!%p1424_p12)
}
 0x60c   : > { %1218 = dma.vmem_to_hbm [thread:$0]  (%p1629_p10), %s1884_s21, 128, %s1882_s6, %s984_s7  }
 0x60d PF: > { %s1010_s15 = sand.u32 1, %s1470_s9   ;;  %p1953_p11 = scmp.ne.s32.totalorder %s1943_s20, 0 }
 0x60e   : > { %p1954_p0 = scmp.ge.s32.totalorder %s1490_s14, 2  ;;  %s1011_s16 = scalar_lea.sflag [#allocation10], %s1010_s15 }
 0x610   : > { %p1229_p5 = pnand %p1954_p0, %p1953_p11 }
 0x612   : > { %1465 = dma.done.wait (!%p1229_p5), %s1011_s16, 128  }
 0x613   : > { %1467 = vsyncadd (!%p1229_p5), %s1011_s16, 4294967168  ;;  %s19_s14 = sadd.s32 1, %s1490_s14   ;;  %s1955_s9 = smov %s1474_s10 }
 0x614   : > { %p16_p9 = scmp.ge.s32.totalorder %s19_s14, 4   ;;  %s1956_s10 = smov %s1478_s11 }
 0x615   : > { %s1957_s11 = smov %s1638_s28  ;;  %s1958_s12 = smov %s1486_s13 }
 0x616   : > { %s1959_s13 = smov %s1961_s25  ;;  %18 = sbr.rel (!%p16_p9) target bundleno = 7 (0x7), region = 111 }
 0x61d   :  { %1016 = vsyncpa [#allocation9], 1 }
 0x61e   :  { %1018 = vsyncpa [#allocation9 + $0x1], 1 }
 0x61f   :  { %1019 = vsyncpa [#allocation12], 1 }
 0x620   :  { %1020 = vsyncpa [#allocation10], 1 }
 0x621   :  { %1022 = vsyncpa [#allocation10 + $0x1], 1 }

</bundles_post_ra>
